<compile_context>
chip_gen: v7x
topology: tpu7x:2x2x1
jax: 0.10.0
libtpu: 0.0.40
codegen_flags: <defaults>
</compile_context>

<pallas_src>
import functools

import jax
import jax.numpy as jnp
from jax.experimental import pallas as pl
from jax.experimental.pallas import tpu as pltpu


NEG_SLOPE = 0.01  # nn.LeakyReLU() default negative_slope


def _leaky_relu(v):
    # valid for 0 < slope < 1:  max(v, slope*v) == leaky_relu(v)
    return jnp.maximum(v, NEG_SLOPE * v)


def _round_up(x, m):
    return ((x + m - 1) // m) * m


def _mlp_kernel(x_ref, *refs):
    """refs = (w0, b0, w1, b1, ..., wN, bN, out).

    x_ref : (tile_b, in_dim) activations (f32 or bf16; cast to bf16 on-chip).
    w_i   : (d_in, d_out) bf16 — whole array, VMEM-resident across grid steps.
    b_i   : (1, d_out) f32     — last bias is unpadded (defines true out width).
    out   : (tile_b, output_dim) f32.
    """
    o_ref = refs[-1]
    wb_refs = refs[:-1]
    n_layers = len(wb_refs) // 2
    out_dim = o_ref.shape[-1]

    h = x_ref[...].astype(jnp.bfloat16)
    for li in range(n_layers):
        w = wb_refs[2 * li][...]        # bf16 [d_in, d_out]
        b = wb_refs[2 * li + 1][...]    # f32  [1, d_out]
        acc = jnp.dot(h, w, preferred_element_type=jnp.float32)
        if li < n_layers - 1:
            h = _leaky_relu(acc + b).astype(jnp.bfloat16)
        else:
            # Last-layer weight columns are zero-padded to a lane multiple for
            # the MXU; slice back to the true output width before the store so
            # only useful bytes are written back to HBM.
            o_ref[...] = (acc[:, :out_dim] + b).astype(o_ref.dtype)


def prepare_params(params):
    """One-time weight packing (hoisted out of the per-call jitted forward).

    params: list of (W [in_features, out_features], b [out] or [1, out]) f32.
    Returns a flat tuple (w0, b0, w1, b1, ...): weights bf16, biases f32 [1,out].
    Only the LAST weight has its output columns zero-padded to a multiple of
    128 (exact zeros, sliced off inside the kernel); the last bias stays
    unpadded so the true output width is recoverable from its shape.
    """
    n_layers = len(params)
    packed = []
    for li, (w, b) in enumerate(params):
        w = jnp.asarray(w, jnp.float32)
        b = jnp.reshape(jnp.asarray(b, jnp.float32), (1, -1))
        if li == n_layers - 1:
            out_dim = w.shape[1]
            out_pad = _round_up(out_dim, 128)
            if out_pad != out_dim:
                w = jnp.pad(w, ((0, 0), (0, out_pad - out_dim)))
        packed.append(w.astype(jnp.bfloat16))
        packed.append(b)
    return tuple(packed)


@functools.partial(jax.jit, static_argnames=("tile_b",))
def mlp_forward(x, packed, *, tile_b=2048):
    """x: [B, input_dim] (f32 or bf16). packed: output of prepare_params()."""
    B, in_dim = x.shape
    n_layers = len(packed) // 2
    out_dim = packed[-1].shape[-1]      # last (unpadded) bias gives true width

    # ---- batch tiling ----------------------------------------------------
    tile_b = max(8, int(tile_b))
    if B < 16:
        # one block covering the whole batch (block dim == array dim is legal)
        tile_b = B
    else:
        # keep >= 2 grid steps so the "parallel" axis can use both v7x cores
        tile_b = min(tile_b, _round_up(pl.cdiv(B, 2), 8))
    grid_b = pl.cdiv(B, tile_b)

    # ---- BlockSpecs --------------------------------------------------------
    x_spec = pl.BlockSpec((tile_b, in_dim), lambda i: (i, 0))
    # Whole-array VMEM operands: single DMA, single buffer, resident weights.
    resident = pl.BlockSpec(memory_space=pltpu.MemorySpace.VMEM)
    in_specs = [x_spec] + [resident] * len(packed)
    out_spec = pl.BlockSpec((tile_b, out_dim), lambda i: (i, 0))

    # ---- explicit VMEM budget (v5e default scoped limit is only 16 MiB) ----
    resident_bytes = sum(int(a.size) * a.dtype.itemsize for a in packed)
    widest = max(int(packed[2 * li].shape[1]) for li in range(n_layers))
    io_bytes = 2 * tile_b * in_dim * x.dtype.itemsize + 2 * tile_b * out_dim * 4
    interm_bytes = 4 * tile_b * widest * 4
    vmem_limit = int(min(64 * 2**20,
                         max(32 * 2**20,
                             2 * (resident_bytes + io_bytes + interm_bytes))))

    out = pl.pallas_call(
        _mlp_kernel,
        out_shape=jax.ShapeDtypeStruct((B, out_dim), jnp.float32),
        grid=(grid_b,),
        in_specs=in_specs,
        out_specs=out_spec,
        compiler_params=pltpu.CompilerParams(
            dimension_semantics=("parallel",),
            vmem_limit_bytes=vmem_limit),
    )(x, *packed)
    return out


def init_params(key, input_dim, output_dim, hidden_sizes=(256, 256)):
    """torch.nn.Linear default init: U[-1/sqrt(fan_in), 1/sqrt(fan_in)].
    Weights returned already transposed to [in, out]; biases as [1, out]."""
    dims = [input_dim, *hidden_sizes, output_dim]
    params = []
    for i in range(len(dims) - 1):
        fan_in, fan_out = dims[i], dims[i + 1]
        key, kw, kb = jax.random.split(key, 3)
        bound = 1.0 / jnp.sqrt(jnp.float32(fan_in))
        w = jax.random.uniform(kw, (fan_in, fan_out), jnp.float32, -bound, bound)
        b = jax.random.uniform(kb, (1, fan_out), jnp.float32, -bound, bound)
        params.append((w, b))
    return params


def reference_forward(x, params):
    """Pure-JAX reference with the same bf16-operand / f32-accumulate math."""
    n = len(params)
    h = x.astype(jnp.bfloat16)
    for li, (w, b) in enumerate(params):
        h = jnp.dot(h, w.astype(jnp.bfloat16),
                    preferred_element_type=jnp.float32) + b.reshape(1, -1)
        if li < n - 1:
            h = jnp.maximum(h, NEG_SLOPE * h).astype(jnp.bfloat16)
    return h


if __name__ == "__main__":
    INPUT_DIM = 32
    OUTPUT_DIM = 4
    HIDDEN = (256, 256)   # nn.MLP default hidden_sizes
    BATCH = 16            # -> 2 grid steps: exercises resident weights / v7x sharding

    key = jax.random.PRNGKey(0)
    key, kx = jax.random.split(key)
    x = jax.random.normal(kx, (BATCH, INPUT_DIM), jnp.float32)

    params = init_params(key, INPUT_DIM, OUTPUT_DIM, HIDDEN)
    packed = prepare_params(params)   # one-time weight pack, outside the jitted forward

    out = jax.block_until_ready(mlp_forward(x, packed))
    ref = reference_forward(x, params)
    assert out.shape == (BATCH, OUTPUT_DIM), out.shape
    assert jnp.allclose(out, ref, atol=2e-3, rtol=2e-3), \
        "mismatch vs pure-JAX reference (f32 input)"

    # bf16-activation path (halves input HBM traffic) + ragged batch tile (B=20, tile 16).
    x2 = jax.random.normal(jax.random.PRNGKey(1), (20, INPUT_DIM),
                           jnp.float32).astype(jnp.bfloat16)
    out2 = jax.block_until_ready(mlp_forward(x2, packed))
    ref2 = reference_forward(x2, params)
    assert out2.shape == (20, OUTPUT_DIM), out2.shape
    assert jnp.allclose(out2, ref2, atol=2e-3, rtol=2e-3), \
        "mismatch vs pure-JAX reference (bf16 input, ragged batch)"

    print("KERNEL_OK")
</pallas_src>

<mosaic_0001>
module attributes {stable_mosaic.version = 11 : i64} {
  func.func @_mlp_kernel(%arg0: i32, %arg1: memref<8x32xf32, #tpu.memory_space<vmem>>, %arg2: memref<32x256xbf16, #tpu.memory_space<vmem>>, %arg3: memref<1x256xf32, #tpu.memory_space<vmem>>, %arg4: memref<256x256xbf16, #tpu.memory_space<vmem>>, %arg5: memref<1x256xf32, #tpu.memory_space<vmem>>, %arg6: memref<256x128xbf16, #tpu.memory_space<vmem>>, %arg7: memref<1x4xf32, #tpu.memory_space<vmem>>, %arg8: memref<8x4xf32, #tpu.memory_space<vmem>>) attributes {dimension_semantics = [#tpu.dimension_semantics<parallel>], iteration_bounds = array<i64: 2>, scalar_prefetch = 0 : i64, scratch_operands = 0 : i64, tpu.core_type = #tpu.core_type<tc>, window_params = [{transform_indices = @transform_0, window_bounds = array<i64: 8, 32>}, {pipeline_mode = #tpu.pipeline_mode<synchronous>, transform_indices = @transform_1, window_bounds = array<i64: 32, 256>}, {pipeline_mode = #tpu.pipeline_mode<synchronous>, transform_indices = @transform_2, window_bounds = array<i64: 1, 256>}, {pipeline_mode = #tpu.pipeline_mode<synchronous>, transform_indices = @transform_3, window_bounds = array<i64: 256, 256>}, {pipeline_mode = #tpu.pipeline_mode<synchronous>, transform_indices = @transform_4, window_bounds = array<i64: 1, 256>}, {pipeline_mode = #tpu.pipeline_mode<synchronous>, transform_indices = @transform_5, window_bounds = array<i64: 256, 128>}, {pipeline_mode = #tpu.pipeline_mode<synchronous>, transform_indices = @transform_6, window_bounds = array<i64: 1, 4>}, {transform_indices = @transform_7, window_bounds = array<i64: 8, 4>}]} {
    %c0 = arith.constant 0 : index
    %c0_0 = arith.constant 0 : index
    %0 = vector.load %arg1[%c0, %c0_0] : memref<8x32xf32, #tpu.memory_space<vmem>>, vector<8x32xf32>
    %1 = arith.truncf %0 : vector<8x32xf32> to vector<8x32xbf16>
    %c0_1 = arith.constant 0 : index
    %c0_2 = arith.constant 0 : index
    %2 = vector.load %arg2[%c0_1, %c0_2] : memref<32x256xbf16, #tpu.memory_space<vmem>>, vector<32x256xbf16>
    %c0_3 = arith.constant 0 : index
    %c0_4 = arith.constant 0 : index
    %3 = vector.load %arg3[%c0_3, %c0_4] : memref<1x256xf32, #tpu.memory_space<vmem>>, vector<1x256xf32>
    %cst = arith.constant dense<0.000000e+00> : vector<8x256xf32>
    %4 = tpu.matmul %1, %2, %cst {dimension_numbers = #tpu.dot_dimension_numbers<[1], [0], [0], [1], [0, 0, 1, 1], [], []>} : vector<8x32xbf16>, vector<32x256xbf16>, vector<8x256xf32> -> vector<8x256xf32>
    %5 = vector.broadcast %3 : vector<1x256xf32> to vector<8x256xf32>
    %6 = arith.addf %4, %5 : vector<8x256xf32>
    %cst_5 = arith.constant 0.00999999977 : f32
    %7 = vector.broadcast %cst_5 : f32 to vector<8x256xf32>
    %8 = arith.mulf %7, %6 : vector<8x256xf32>
    %9 = arith.maximumf %6, %8 : vector<8x256xf32>
    %10 = arith.truncf %9 : vector<8x256xf32> to vector<8x256xbf16>
    %c0_6 = arith.constant 0 : index
    %c0_7 = arith.constant 0 : index
    %11 = vector.load %arg4[%c0_6, %c0_7] : memref<256x256xbf16, #tpu.memory_space<vmem>>, vector<256x256xbf16>
    %c0_8 = arith.constant 0 : index
    %c0_9 = arith.constant 0 : index
    %12 = vector.load %arg5[%c0_8, %c0_9] : memref<1x256xf32, #tpu.memory_space<vmem>>, vector<1x256xf32>
    %cst_10 = arith.constant dense<0.000000e+00> : vector<8x256xf32>
    %13 = tpu.matmul %10, %11, %cst_10 {dimension_numbers = #tpu.dot_dimension_numbers<[1], [0], [0], [1], [0, 0, 1, 1], [], []>} : vector<8x256xbf16>, vector<256x256xbf16>, vector<8x256xf32> -> vector<8x256xf32>
    %14 = vector.broadcast %12 : vector<1x256xf32> to vector<8x256xf32>
    %15 = arith.addf %13, %14 : vector<8x256xf32>
    %cst_11 = arith.constant 0.00999999977 : f32
    %16 = vector.broadcast %cst_11 : f32 to vector<8x256xf32>
    %17 = arith.mulf %16, %15 : vector<8x256xf32>
    %18 = arith.maximumf %15, %17 : vector<8x256xf32>
    %19 = arith.truncf %18 : vector<8x256xf32> to vector<8x256xbf16>
    %c0_12 = arith.constant 0 : index
    %c0_13 = arith.constant 0 : index
    %20 = vector.load %arg6[%c0_12, %c0_13] : memref<256x128xbf16, #tpu.memory_space<vmem>>, vector<256x128xbf16>
    %c0_14 = arith.constant 0 : index
    %c0_15 = arith.constant 0 : index
    %21 = vector.load %arg7[%c0_14, %c0_15] : memref<1x4xf32, #tpu.memory_space<vmem>>, vector<1x4xf32>
    %cst_16 = arith.constant dense<0.000000e+00> : vector<8x128xf32>
    %22 = tpu.matmul %19, %20, %cst_16 {dimension_numbers = #tpu.dot_dimension_numbers<[1], [0], [0], [1], [0, 0, 1, 1], [], []>} : vector<8x256xbf16>, vector<256x128xbf16>, vector<8x128xf32> -> vector<8x128xf32>
    %23 = vector.extract_strided_slice %22 {offsets = [0, 0], sizes = [8, 4], strides = [1, 1]} : vector<8x128xf32> to vector<8x4xf32>
    %24 = vector.broadcast %21 : vector<1x4xf32> to vector<8x4xf32>
    %25 = arith.addf %23, %24 : vector<8x4xf32>
    %c0_17 = arith.constant 0 : index
    %c0_18 = arith.constant 0 : index
    %26 = vector.load %arg8[%c0_17, %c0_18] : memref<8x4xf32, #tpu.memory_space<vmem>>, vector<8x4xf32>
    tpu.vector_store %arg8[%c0_17, %c0_18], %25 {strides = array<i32>} : memref<8x4xf32, #tpu.memory_space<vmem>>, vector<8x4xf32>,
    return
  }
  func.func @transform_0(%arg0: i32) -> (i32, i32) {
    %c0_i32 = arith.constant 0 : i32
    %c0_i32_0 = arith.constant 0 : i32
    return %arg0, %c0_i32 : i32, i32
  }
  func.func @transform_1(%arg0: i32) -> (i32, i32) {
    %c0_i32 = arith.constant 0 : i32
    %c0_i32_0 = arith.constant 0 : i32
    %c0_i32_1 = arith.constant 0 : i32
    return %c0_i32, %c0_i32_0 : i32, i32
  }
  func.func @transform_2(%arg0: i32) -> (i32, i32) {
    %c0_i32 = arith.constant 0 : i32
    %c0_i32_0 = arith.constant 0 : i32
    %c0_i32_1 = arith.constant 0 : i32
    return %c0_i32, %c0_i32_0 : i32, i32
  }
  func.func @transform_3(%arg0: i32) -> (i32, i32) {
    %c0_i32 = arith.constant 0 : i32
    %c0_i32_0 = arith.constant 0 : i32
    %c0_i32_1 = arith.constant 0 : i32
    return %c0_i32, %c0_i32_0 : i32, i32
  }
  func.func @transform_4(%arg0: i32) -> (i32, i32) {
    %c0_i32 = arith.constant 0 : i32
    %c0_i32_0 = arith.constant 0 : i32
    %c0_i32_1 = arith.constant 0 : i32
    return %c0_i32, %c0_i32_0 : i32, i32
  }
  func.func @transform_5(%arg0: i32) -> (i32, i32) {
    %c0_i32 = arith.constant 0 : i32
    %c0_i32_0 = arith.constant 0 : i32
    %c0_i32_1 = arith.constant 0 : i32
    return %c0_i32, %c0_i32_0 : i32, i32
  }
  func.func @transform_6(%arg0: i32) -> (i32, i32) {
    %c0_i32 = arith.constant 0 : i32
    %c0_i32_0 = arith.constant 0 : i32
    %c0_i32_1 = arith.constant 0 : i32
    return %c0_i32, %c0_i32_0 : i32, i32
  }
  func.func @transform_7(%arg0: i32) -> (i32, i32) {
    %c0_i32 = arith.constant 0 : i32
    %c0_i32_0 = arith.constant 0 : i32
    return %arg0, %c0_i32 : i32, i32
  }
}

</mosaic_0001>

<bundles_post_ra>
// kernel: mlp_forward.1
= control target key start
LH: loop header
LB: loop body
LE: loop exit
PB: predicated region body
PF: predicated region fallthrough
CT: control target
= control target key end

     0   :  { %12 = vsyncpa [#allocation3], 0  ;;  %s1608_s0 = inlined_call_operand.hbm [shape: f32[16,32], index: 0, kind: input, shape index: {}]   ;;  %s1609_s1 = inlined_call_operand.hbm [shape: bf16[32,256], index: 1, kind: input, shape index: {}]   ;;  %s1610_s2 = inlined_call_operand.vmem [shape: f32[1,256], index: 2, kind: input, shape index: {}]   ;;  %s1611_s3 = inlined_call_operand.hbm [shape: bf16[256,256], index: 3, kind: input, shape index: {}]   ;;  %s1612_s4 = inlined_call_operand.vmem [shape: f32[1,256], index: 4, kind: input, shape index: {}]   ;;  %s1613_s5 = inlined_call_operand.hbm [shape: bf16[256,128], index: 5, kind: input, shape index: {}]   ;;  %s1614_s6 = inlined_call_operand.vmem [shape: f32[1,4], index: 6, kind: input, shape index: {}]   ;;  %s1615_s7 = inlined_call_operand.vmem [shape: f32[16,4], index: 7, kind: output, shape index: {}]  }
   0x1   :  { %14 = vsyncpa [#allocation3 + $0x1], 0 }
   0x2   :  { %15 = vsyncpa [#allocation5], 0 }
   0x3   :  { %16 = vsyncpa [#allocation8], 0  ;;  %s1395_s24 = smov 0   ;;  %s1397_s25 = smov 0  }
   0x4   :  { %s1399_s26 = smov 0   ;;  %s1401_s27 = smov 0  }
   0x5 LB: > { %s1414_s28 = sadd.s32 4294967295, %s1344_s27   ;;  %p42_p0 = scmp.ne.s32.totalorder %s1336_s25, %s1332_s24  ;;  %s1344_s27 = sphi %s1401_s27, %s1633_s27   ;;  %s1340_s26 = sphi %s1399_s26, %s1632_s26   ;;  %s1336_s25 = sphi %s1397_s25, %s1631_s25   ;;  %s1332_s24 = sphi %s1395_s24, %s1630_s24  }
   0x6   : > { %p1616_p1 = scmp.eq.s32.totalorder %s1414_s28, 0  ;;  %p952_p2 = scmp.ge.s32.totalorder %s1344_s27, 1 }
   0x7   : > { %p205_p3 = scmp.lt.s32.totalorder %s1344_s27, 3  ;;  %s1346_s8 = smov [#allocation4]  }
   0x8   : > { %p1422_p4 = por %p1616_p1, %p42_p0  ;;  %s217_s9 = sshll.u32 %s1346_s8, 4  ;;  %s1430_s9 = int_to_ptr.vmem [resolvable:$true] %s217_s9 }
   0x9   : > { %p1426_p5 = pnand %p952_p2, %p205_p3  ;;  %s1347_s11 = smov [#allocation6]  }
   0xa   : > { %s1619_s29 = scalar_select %p1422_p4, 1, 0 }
   0xb   : > { %s1620_s30 = scalar_select %p1426_p5, 1, 0 }
   0xc   : > { %p1057_p6 = pneg %p1426_p5  ;;  %s233_s12 = sshll.u32 %s1347_s11, 4  ;;  %s1440_s12 = int_to_ptr.vmem [resolvable:$true] %s233_s12 }
   0xd   : > { %s1348_s13 = smov [#allocation7]   ;;  %s1188_s17 = scalar_lea.hbm %s1609_s1, 512 }
   0xe   : > { %p1436_p7 = pnand %p1057_p6, %p1616_p1  ;;  %s1442_s14 = sshll.u32 %s1348_s13, 4  ;;  %s250_s14 = int_to_ptr.vmem [resolvable:$true] %s1442_s14 }
   0xf   : > { %p1189_p8 = scmp.ne.s32.totalorder %s1609_s1, %s1188_s17  ;;  %p1195_p12 = scmp.lt.u32.totalorder %s1188_s17, %s1609_s1 }
  0x10   : > { %p1452_p9 = pneg %p1436_p7 }
  0x12   : > { %p1191_p10 = pnand %p1452_p9, %p1189_p8 }
  0x14   : > { %p1192_p11 = pneg %p1191_p10 }
  0x16   : > { %p1197_p13 = pnand %p1195_p12, %p1192_p11 }
  0x18   : > { %1200 = shalt.err (!%p1197_p13)
}
  0x19   : > { %s1201_s23 = scalar_lea.vmem %s1430_s9, 512  ;;  %p1209_p6 = scmp.lt.s32.totalorder %s1430_s9, %s1430_s9 }
  0x1a   : > { %p1202_p0 = scmp.ne.s32.totalorder %s1430_s9, %s1201_s23  ;;  %p1210_p1 = scmp.lt.s32.totalorder %s1201_s23, %s1201_s23 }
  0x1c   : > { %p1204_p2 = pnand %p1202_p0, %p1452_p9  ;;  %p1211_p8 = por %p1210_p1, %p1209_p6 }
  0x1e   : > { %p1205_p3 = pneg %p1204_p2 }
  0x20   : > { %p1212_p10 = pnand %p1211_p8, %p1205_p3 }
  0x22   : > { %1215 = shalt.err (!%p1212_p10)
}
  0x23   : > { %s1349_s24 = smov 128   ;;  %s1350_s8 = smov 8  }
  0x24   : > { %1060 = dma.hbm_to_vmem [thread:$0]  (!%p1436_p7), %s1609_s1, 512, %s1430_s9, [#allocation5], %s1349_s24, %s1349_s24, %s1350_s8  }
  0x25   : > { %s1216_s17 = scalar_lea.hbm %s1611_s3, 4096 }
  0x26   : > { %p1217_p1 = scmp.ne.s32.totalorder %s1611_s3, %s1216_s17  ;;  %p1223_p13 = scmp.lt.u32.totalorder %s1216_s17, %s1611_s3 }
  0x28   : > { %p1219_p11 = pnand %p1217_p1, %p1452_p9 }
  0x2a   : > { %p1220_p12 = pneg %p1219_p11 }
  0x2c   : > { %p1225_p0 = pnand %p1223_p13, %p1220_p12 }
  0x2e   : > { %1228 = shalt.err (!%p1225_p0)
}
  0x2f   : > { %s1229_s9 = scalar_lea.vmem %s1440_s12, 4096  ;;  %p1237_p8 = scmp.lt.s32.totalorder %s1440_s12, %s1440_s12 }
  0x30   : > { %p1230_p2 = scmp.ne.s32.totalorder %s1440_s12, %s1229_s9  ;;  %p1238_p10 = scmp.lt.s32.totalorder %s1229_s9, %s1229_s9 }
  0x32   : > { %p1232_p3 = pnand %p1230_p2, %p1452_p9  ;;  %p1239_p1 = por %p1238_p10, %p1237_p8 }
  0x34   : > { %p1233_p6 = pneg %p1232_p3 }
  0x36   : > { %p1240_p11 = pnand %p1239_p1, %p1233_p6 }
  0x38   : > { %1243 = shalt.err (!%p1240_p11)
}
  0x39   : > { %1063 = dma.hbm_to_vmem [thread:$0]  (!%p1436_p7), %s1611_s3, 4096, %s1440_s12, [#allocation5], %s1349_s24, %s1349_s24, %s1350_s8  }
  0x3a   : > { %s1244_s16 = scalar_lea.hbm %s1613_s5, 2048 }
  0x3b   : > { %p1245_p12 = scmp.ne.s32.totalorder %s1613_s5, %s1244_s16  ;;  %p1251_p2 = scmp.lt.u32.totalorder %s1244_s16, %s1613_s5 }
  0x3d   : > { %p1247_p13 = pnand %p1245_p12, %p1452_p9 }
  0x3f   : > { %p1248_p0 = pneg %p1247_p13 }
  0x41   : > { %p1253_p3 = pnand %p1251_p2, %p1248_p0 }
  0x43   : > { %1256 = shalt.err (!%p1253_p3)
}
  0x44   : > { %s1257_s22 = scalar_lea.vmem %s250_s14, 2048  ;;  %p1265_p1 = scmp.lt.s32.totalorder %s250_s14, %s250_s14 }
  0x45   : > { %p1258_p6 = scmp.ne.s32.totalorder %s250_s14, %s1257_s22  ;;  %p1266_p11 = scmp.lt.s32.totalorder %s1257_s22, %s1257_s22 }
  0x47   : > { %p1260_p8 = pnand %p1258_p6, %p1452_p9  ;;  %p1267_p4 = por %p1266_p11, %p1265_p1 }
  0x49   : > { %p1261_p10 = pneg %p1260_p8 }
  0x4b   : > { %p1268_p5 = pnand %p1267_p4, %p1261_p10 }
  0x4d   : > { %1271 = shalt.err (!%p1268_p5)
}
  0x4e   : > { %s1351_s12 = smov 64   ;;  %s1352_s20 = smov 4  }
  0x4f   : > { %1066 = dma.hbm_to_vmem [thread:$0]  (!%p1436_p7), %s1613_s5, 2048, %s250_s14, [#allocation8], %s1351_s12, %s1351_s12, %s1352_s20  }
  0x50   : > { %s1516_s9 = sadd.s32 1, %s1344_s27   ;;  %s29_s11 = sadd.s32 1, %s1340_s26 }
  0x51   : > { %s26_s23 = ssub.s32 %s1344_s27, %s1516_s9  ;;  %p36_p5 = scmp.ne.s32.totalorder %s1340_s26, %s1336_s25 }
  0x52   : > { %p27_p4 = scmp.eq.s32.totalorder %s26_s23, 0  ;;  %p37_p9 = scmp.eq.s32.totalorder %s1344_s27, 0 }
  0x53   : > { %p1074_p12 = scmp.lt.s32.totalorder %s1344_s27, 2  ;;  %s266_s15 = sand.u32 1, %s1340_s26  }
  0x54   : > { %s1526_s13 = scalar_select %p27_p4, %s1340_s26, %s29_s11  }
  0x55   : > { %p38_p13 = por %p37_p9, %p36_p5  ;;  %s957_s16 = sshll.u32 %s266_s15, 3 }
  0x56   : > { %s958_s17 = sshll.u32 %s1344_s27, 7  ;;  %s270_s14 = scalar_lea.vmem [#allocation2], %s957_s16 }
  0x57   : > { %s1533_s19 = scalar_lea.hbm %s1608_s0, %s958_s17  ;;  %s277_s21 = sshll.u32 %s270_s14, 4  ;;  %s1535_s21 = int_to_ptr.vmem [resolvable:$true] %s277_s21 }
  0x58   : > { %p1537_p7 = pnand %p1074_p12, %p38_p13  ;;  %s267_s27 = scalar_lea.sflag [#allocation3], %s266_s15 }
  0x59   : > { %s1272_s12 = scalar_lea.hbm %s1533_s19, 128  ;;  %s1277_s8 = scalar_lea.hbm %s1608_s0, 256 }
  0x5a   : > { %p1273_p0 = scmp.ne.s32.totalorder %s1533_s19, %s1272_s12  ;;  %p1274_p2 = pneg %p1537_p7 }
  0x5b   : > { %p1278_p8 = scmp.lt.u32.totalorder %s1533_s19, %s1608_s0  ;;  %p1279_p10 = scmp.lt.u32.totalorder %s1277_s8, %s1272_s12 }
  0x5c   : > { %p1275_p3 = pnand %p1274_p2, %p1273_p0  ;;  %p1281_p11 = scmp.lt.u32.totalorder %s1272_s12, %s1533_s19 }
  0x5d   : > { %p1280_p1 = por %p1279_p10, %p1278_p8 }
  0x5e   : > { %p1276_p6 = pneg %p1275_p3 }
  0x5f   : > { %p1282_p4 = por %p1281_p11, %p1280_p1 }
  0x61   : > { %p1283_p5 = pnand %p1282_p4, %p1276_p6 }
  0x63   : > { %1286 = shalt.err (!%p1283_p5)
}
  0x64   : > { %s1287_s15 = scalar_lea.vmem %s1535_s21, 128  ;;  %s1353_s16 = smov [#allocation2]  }
  0x65   : > { %p1288_p9 = scmp.ne.s32.totalorder %s1535_s21, %s1287_s15  ;;  %s1292_s17 = sshll.u32 %s1353_s16, 4  ;;  %s1293_s17 = int_to_ptr.vmem [resolvable:$false] %s1292_s17 }
  0x66   : > { %s1294_s10 = scalar_lea.vmem %s1293_s17, 256  ;;  %p1295_p0 = scmp.lt.s32.totalorder %s1535_s21, %s1293_s17 }
  0x67   : > { %p1290_p12 = pnand %p1288_p9, %p1274_p2  ;;  %p1296_p3 = scmp.lt.s32.totalorder %s1294_s10, %s1287_s15 }
  0x69   : > { %p1291_p13 = pneg %p1290_p12  ;;  %p1297_p8 = por %p1296_p3, %p1295_p0 }
  0x6b   : > { %p1298_p10 = pnand %p1297_p8, %p1291_p13 }
  0x6d   : > { %1301 = shalt.err (!%p1298_p10)
}
  0x6e   : > { %1070 = dma.hbm_to_vmem [thread:$0]  (!%p1537_p7), %s1533_s19, 128, %s1535_s21, %s267_s27  }
  0x6f   : > { %p1624_p6 = scmp.ne.s32.totalorder %s1620_s30, 0 }
  0x70   : > { %s288_s18 = sand.u32 (!%p1624_p6), 1, %s1336_s25   ;;  %p1625_p2 = scmp.ne.s32.totalorder (!%p1624_p6), %s1619_s29, 0 }
  0x71   : > { %286 = sbr.rel (%p1624_p6) target bundleno = 798 (0x31e), region = 48  ;;  %s960_s14 = sshll.u32 (!%p1624_p6), %s288_s18, 3 }
  0x72   : > { %s289_s12 = scalar_lea.sflag (!%p1624_p6), [#allocation3], %s288_s18  ;;  %s292_s20 = scalar_lea.vmem (!%p1624_p6), [#allocation2], %s960_s14 }
  0x78   : > { %1319 = dma.done.wait (%p1625_p2), %s289_s12, 128  }
  0x79   : > { %1321 = vsyncadd (%p1625_p2), %s289_s12, 4294967168  ;;  %p1626_p1 = scmp.eq.s32.totalorder %s1414_s28, 0 }
  0x7b   : > { %1323 = dma.done.wait (%p1626_p1), [#allocation5], 4608   ;;  %p1627_p11 = pmov %p1626_p1 }
  0x7c   : > { %p1628_p7 = pmov %p1626_p1 }
  0x7d   : > { %1325 = vsyncadd (%p1627_p11), [#allocation5], 4294962688 }
  0x7e   : > { %1327 = dma.done.wait (%p1628_p7), [#allocation8], 2048   ;;  %p1629_p4 = pmov %p1626_p1 }
  0x7f   : > { %v1354_v0 = vmov 0   ;;  %v1118_v1 = vld [vmem:[#allocation4 + $0x4] ss:$8 sps:$4 sm:$0xff]   ;;  %v1120_v2 = vld [vmem:[#allocation4] ss:$8 sps:$4 sm:$0xff]   ;;  %v339_v5 = vld [vmem:[%s292_s20] sm:$0xff]  ;;  %v347_v50 = vlaneseq }
  0x80   : > { %1329 = vsyncadd (%p1629_p4), [#allocation8], 4294965248  ;;  %413 = vmatprep.mubr.bf16.mxu0 %v1354_v0  ;;  %381 = vmatprep.subr.bf16.mxu0 %v1118_v1  ;;  %v1121_v3 = vld [vmem:[#allocation4 + $0x14] ss:$8 sps:$4 sm:$0xff]   ;;  %v1123_v4 = vld [vmem:[#allocation4 + $0x10] ss:$8 sps:$4 sm:$0xff]   ;;  %v340_v9 = vpack.c.bf16 %v339_v5, %v339_v5 }
  0x81   : > { %382 = vmatpush1.bf16.msra.mxu0 %v1120_v2  ;;  %v1124_v6 = vld [vmem:[#allocation6 + $0x4] ss:$8 sps:$4 sm:$0xff]   ;;  %v1126_v7 = vld [vmem:[#allocation6] ss:$8 sps:$4 sm:$0xff]   ;;  %v1127_v8 = vld [vmem:[#allocation6 + $0x14] ss:$8 sps:$4 sm:$0xff]  }
  0x82   : > { %383 = vmatprep.subr.bf16.mxu0 %v1121_v3  ;;  %632 = vmatprep.subr.bf16.mxu1 %v1124_v6  ;;  %v1129_v10 = vld [vmem:[#allocation6 + $0x10] ss:$8 sps:$4 sm:$0xff]   ;;  %vm377_vm0 = vcmask 261120   ;;  %v1130_v11 = vld [vmem:[#allocation6 + $0x24] ss:$8 sps:$4 sm:$0xff]   ;;  %v348_v51 = vshrl.u32 %v347_v50, 7 }
  0x83   : > { %633 = vmatpush1.bf16.msra.mxu1 %v1126_v7  ;;  %v1132_v12 = vld [vmem:[#allocation6 + $0x20] ss:$8 sps:$4 sm:$0xff]   ;;  %v1133_v13 = vld [vmem:[#allocation6 + $0x34] ss:$8 sps:$4 sm:$0xff]   ;;  %v1135_v14 = vld [vmem:[#allocation6 + $0x30] ss:$8 sps:$4 sm:$0xff]  }
  0x84   : > { %634 = vmatprep.subr.bf16.mxu1 %v1127_v8  ;;  %v1136_v15 = vld [vmem:[#allocation6 + $0x44] ss:$8 sps:$4 sm:$0xff]   ;;  %v1138_v16 = vld [vmem:[#allocation6 + $0x40] ss:$8 sps:$4 sm:$0xff]   ;;  %v1139_v17 = vld [vmem:[#allocation6 + $0x54] ss:$8 sps:$4 sm:$0xff]  }
  0x85   : > { %384 = vmatpush1.bf16.msra.mxu0 %v1123_v4  ;;  %v1141_v18 = vld [vmem:[#allocation6 + $0x50] ss:$8 sps:$4 sm:$0xff]   ;;  %v1142_v19 = vld [vmem:[#allocation6 + $0x64] ss:$8 sps:$4 sm:$0xff]   ;;  %v1144_v20 = vld [vmem:[#allocation6 + $0x60] ss:$8 sps:$4 sm:$0xff]  }
  0x86   : > { %v1145_v21 = vld [vmem:[#allocation6 + $0x74] ss:$8 sps:$4 sm:$0xff]   ;;  %v1147_v22 = vld [vmem:[#allocation6 + $0x70] ss:$8 sps:$4 sm:$0xff]   ;;  %v1148_v23 = vld [vmem:[#allocation6 + $0x84] ss:$8 sps:$4 sm:$0xff]  }
  0x87   : > { %635 = vmatpush1.bf16.msra.mxu1 %v1129_v10  ;;  %v1150_v24 = vld [vmem:[#allocation6 + $0x80] ss:$8 sps:$4 sm:$0xff]   ;;  %v1151_v25 = vld [vmem:[#allocation6 + $0x94] ss:$8 sps:$4 sm:$0xff]   ;;  %v1153_v26 = vld [vmem:[#allocation6 + $0x90] ss:$8 sps:$4 sm:$0xff]  }
  0x88   : > { %969 = vmatmul.mubr.msk.bf16.vlgmr.msra.gmra.mrb[0].mxu0 %vm377_vm0, %v340_v9  ;;  %636 = vmatprep.subr.bf16.mxu1 %v1130_v11  ;;  %v1154_v27 = vld [vmem:[#allocation6 + $0xa4] ss:$8 sps:$4 sm:$0xff]   ;;  %v1156_v28 = vld [vmem:[#allocation6 + $0xa0] ss:$8 sps:$4 sm:$0xff]   ;;  %v1157_v29 = vld [vmem:[#allocation6 + $0xb4] ss:$8 sps:$4 sm:$0xff]  }
  0x89   : > { %v1159_v30 = vld [vmem:[#allocation6 + $0xb0] ss:$8 sps:$4 sm:$0xff]   ;;  %v1160_v31 = vld [vmem:[#allocation6 + $0xc4] ss:$8 sps:$4 sm:$0xff]   ;;  %v1162_v32 = vld [vmem:[#allocation6 + $0xc0] ss:$8 sps:$4 sm:$0xff]  }
  0x8a   : > { %v1163_v33 = vld [vmem:[#allocation6 + $0xd4] ss:$8 sps:$4 sm:$0xff]   ;;  %v1165_v34 = vld [vmem:[#allocation6 + $0xd0] ss:$8 sps:$4 sm:$0xff]   ;;  %v1166_v35 = vld [vmem:[#allocation6 + $0xe4] ss:$8 sps:$4 sm:$0xff]  }
  0x8b   : > { %637 = vmatpush1.bf16.msra.mxu1 %v1132_v12  ;;  %v1168_v36 = vld [vmem:[#allocation6 + $0xe0] ss:$8 sps:$4 sm:$0xff]   ;;  %v1169_v37 = vld [vmem:[#allocation6 + $0xf4] ss:$8 sps:$4 sm:$0xff]   ;;  %v1171_v38 = vld [vmem:[#allocation6 + $0xf0] ss:$8 sps:$4 sm:$0xff]  }
  0x8c   : > { %638 = vmatprep.subr.bf16.mxu1 %v1133_v13  ;;  %v1172_v39 = vld [vmem:[#allocation7 + $0x40] sm:$0xff]   ;;  %v1174_v41 = vld [vmem:[#allocation7 + $0x48] sm:$0xff]   ;;  %v1176_v43 = vld [vmem:[#allocation7 + $0x50] sm:$0xff]   ;;  %v349_v52 = vsub.s32 0, %v348_v51  ;;  %v353_v54 = vsub.s32 1, %v348_v51  ;;  %p334_p5 = scmp.lt.s32.totalorder %s1414_s28, 1 }
  0x8d   : > { %v1173_v40 = vld [vmem:[#allocation7] sm:$0xff]   ;;  %1021 = vmatprep.subr.bf16.mxu0 %v1172_v39  ;;  %v1175_v42 = vld [vmem:[#allocation7 + $0x8] sm:$0xff]   ;;  %v1177_v44 = vld [vmem:[#allocation7 + $0x10] sm:$0xff]   ;;  %vm855_vm1 = vcmask 31744  }
  0x8e   : > { %1022 = vmatpush3.bf16.msra.mxu0 %v1173_v40  ;;  %v1178_v45 = vld [vmem:[#allocation7 + $0x58] sm:$0xff]   ;;  %v1180_v47 = vld [vmem:[#allocation7 + $0x60] sm:$0xff]   ;;  %v1182_v49 = vld [vmem:[#allocation7 + $0x68] sm:$0xff]   ;;  %s1635_s28 = smov (!%p334_p5, %s1414_s28), 1 }
  0x8f   : > { %639 = vmatpush1.bf16.msra.mxu1 %v1135_v14  ;;  %1023 = vmatprep.subr.bf16.mxu0 %v1174_v41  ;;  %v1179_v46 = vld [vmem:[#allocation7 + $0x18] sm:$0xff]   ;;  %v1181_v48 = vld [vmem:[#allocation7 + $0x20] sm:$0xff]   ;;  %v345_v53 = vld [vmem:[%s1610_s2] sm:$0x3]  ;;  %s964_s22 = sshll.u32 %s1635_s28, 3 }
  0x90   : > { %640 = vmatprep.subr.bf16.mxu1 %v1136_v15  ;;  %v350_v55 = vrot.slane %v345_v53, %v349_v52  ;;  %v354_v56 = vrot.slane %v345_v53, %v353_v54  ;;  %v1183_v5 = vld [vmem:[#allocation7 + $0x28] sm:$0xff]   ;;  %v1184_v6 = vld [vmem:[#allocation7 + $0x70] sm:$0xff]   ;;  %v1186_v8 = vld [vmem:[#allocation7 + $0x78] sm:$0xff]   ;;  %s337_s11 = scalar_lea.vmem %s1615_s7, %s964_s22 }
  0x91   : > { %v1185_v7 = vld [vmem:[#allocation7 + $0x30] sm:$0xff]   ;;  %v1187_v9 = vld [vmem:[#allocation7 + $0x38] sm:$0xff]  }
  0x92   : > { %1024 = vmatpush3.bf16.msra.mxu0 %v1175_v42  ;;  %v460_v10 = vld [vmem:[%s1612_s4] sm:$0x3] }
  0x93   : > { %641 = vmatpush1.bf16.msra.mxu1 %v1138_v16  ;;  %1025 = vmatprep.subr.bf16.mxu0 %v1176_v43  ;;  %v465_v11 = vrot.slane %v460_v10, %v349_v52  ;;  %v469_v12 = vrot.slane %v460_v10, %v353_v54 }
  0x94   : > { %642 = vmatprep.subr.bf16.mxu1 %v1139_v17 }
  0x96   : > { %1026 = vmatpush3.bf16.msra.mxu0 %v1177_v44 }
  0x97   : > { %643 = vmatpush1.bf16.msra.mxu1 %v1141_v18  ;;  %1027 = vmatprep.subr.bf16.mxu0 %v1178_v45 }
  0x98   : > { %644 = vmatprep.subr.bf16.mxu1 %v1142_v19 }
  0x9a   : > { %1028 = vmatpush3.bf16.msra.mxu0 %v1179_v46 }
  0x9b   : > { %645 = vmatpush1.bf16.msra.mxu1 %v1144_v20  ;;  %1029 = vmatprep.subr.bf16.mxu0 %v1180_v47 }
  0x9c   : > { %646 = vmatprep.subr.bf16.mxu1 %v1145_v21 }
  0x9e   : > { %1030 = vmatpush3.bf16.msra.mxu0 %v1181_v48 }
  0x9f   : > { %647 = vmatpush1.bf16.msra.mxu1 %v1147_v22  ;;  %1031 = vmatprep.subr.bf16.mxu0 %v1182_v49 }
  0xa0   : > { %648 = vmatprep.subr.bf16.mxu1 %v1148_v23 }
  0xa2   : > { %1032 = vmatpush3.bf16.msra.mxu0 %v1183_v5 }
  0xa3   : > { %649 = vmatpush1.bf16.msra.mxu1 %v1150_v24  ;;  %1033 = vmatprep.subr.bf16.mxu0 %v1184_v6 }
  0xa4   : > { %650 = vmatprep.subr.bf16.mxu1 %v1151_v25 }
  0xa6   : > { %1034 = vmatpush3.bf16.msra.mxu0 %v1185_v7 }
  0xa7   : > { %651 = vmatpush1.bf16.msra.mxu1 %v1153_v26  ;;  %1035 = vmatprep.subr.bf16.mxu0 %v1186_v8  ;;  %v1018_v26 = vld [vmem:[%s1614_s6] ss:$0 sm:$0xff] }
  0xa8   : > { %652 = vmatprep.subr.bf16.mxu1 %v1154_v27 }
  0xaa   : > { %1036 = vmatpush3.bf16.msra.mxu0 %v1187_v9 }
  0xab   : > { %653 = vmatpush1.bf16.msra.mxu1 %v1156_v28 }
  0xac   : > { %654 = vmatprep.subr.bf16.mxu1 %v1157_v29 }
  0xaf   : > { %655 = vmatpush1.bf16.msra.mxu1 %v1159_v30 }
  0xb0   : > { %656 = vmatprep.subr.bf16.mxu1 %v1160_v31 }
  0xb3   : > { %657 = vmatpush1.bf16.msra.mxu1 %v1162_v32 }
  0xb4   : > { %658 = vmatprep.subr.bf16.mxu1 %v1163_v33 }
  0xb7   : > { %659 = vmatpush1.bf16.msra.mxu1 %v1165_v34 }
  0xb8   : > { %660 = vmatprep.subr.bf16.mxu1 %v1166_v35 }
  0xbb   : > { %661 = vmatpush1.bf16.msra.mxu1 %v1168_v36 }
  0xbc   : > { %662 = vmatprep.subr.bf16.mxu1 %v1169_v37 }
  0xbf   : > { %663 = vmatpush1.bf16.msra.mxu1 %v1171_v38 }
 0x15b   : > { %v415_v57 = vpop.f32.mrb[0].mxu0 }
 0x15c   : > { %v416_v58 = vadd.f32 %v415_v57, %v350_v55  ;;  %v417_v59 = vpop.f32.mrb[1].mxu0 }
 0x15d   : > { %v418_v60 = vadd.f32 %v417_v59, %v354_v56  ;;  %v419_v61 = vpop.f32.mrb[2].mxu0 }
 0x15e   : > { %v422_v62 = vmul.f32 0.01, %v416_v58  ;;  %v420_v63 = vpop.f32.mrb[3].mxu0 }
 0x15f   : > { %v423_v0 = vmul.f32 0.01, %v418_v60 }
 0x160   : > { %v424_v1 = vmax.f32 %v416_v58, %v422_v62 }
 0x161   : > { %v425_v2 = vmax.f32 %v418_v60, %v423_v0 }
 0x162   : > { %v426_v4 = vpack.c.bf16 %v424_v1, %v424_v1 }
 0x163   : > { %v427_v3 = vpack.c.bf16 %v425_v2, %v425_v2 }
 0x165   : > { %664 = vmatprep.mubr.bf16.mxu1 %v427_v3 }
 0x166   : > { %665 = vmatmul.mubr.bf16.vlgmr.msra.gmra.mrb[0].mxu1 %v426_v4 }
 0x239   : > { %v666_v13 = vpop.f32.mrb[0].mxu1 }
 0x23a   : > { %v667_v14 = vadd.f32 %v666_v13, %v465_v11  ;;  %v668_v15 = vpop.f32.mrb[1].mxu1 }
 0x23b   : > { %v669_v16 = vadd.f32 %v668_v15, %v469_v12  ;;  %v670_v17 = vpop.f32.mrb[2].mxu1 }
 0x23c   : > { %v673_v18 = vmul.f32 0.01, %v667_v14  ;;  %v671_v19 = vpop.f32.mrb[3].mxu1 }
 0x23d   : > { %v674_v20 = vmul.f32 0.01, %v669_v16 }
 0x23e   : > { %v675_v21 = vmax.f32 %v667_v14, %v673_v18 }
 0x23f   : > { %v676_v22 = vmax.f32 %v669_v16, %v674_v20 }
 0x240   : > { %v677_v24 = vpack.c.bf16 %v675_v21, %v675_v21 }
 0x241   : > { %v678_v23 = vpack.c.bf16 %v676_v22, %v676_v22 }
 0x243   : > { %840 = vmatprep.mubr.bf16.mxu0 %v678_v23 }
 0x244   : > { %841 = vmatmul.mubr.bf16.vlgmr.msra.gmra.mrb[4].mxu0 %v677_v24 }
 0x317   : > { %v1037_v25 = vpop.f32.mrb[4].mxu0 }
 0x318   : > { %v1038_v27 = vpop.f32.mrb[5].mxu0 }
 0x319   : > { %v1039_v28 = vadd.f32 %v1038_v27, %v1037_v25  ;;  %v1040_v29 = vpop.f32.mrb[6].mxu0 }
 0x31a   : > { %v1041_v30 = vpop.f32.mrb[7].mxu0 }
 0x31b   : > { %v854_v31 = vadd.f32 %v1039_v28, %v1018_v26 }
 0x31d   : > { %856 = vst.msk [vmem:[%s337_s11] sm:$0xff] %vm855_vm1, %v854_v31 }
 0x31e PF: > { %p19_p9 = scmp.ge.s32.totalorder %s1516_s9, 4   ;;  %s1630_s24 = smov %s1336_s25 }
 0x31f   : > { %s1631_s25 = smov %s1340_s26  ;;  %s1632_s26 = smov %s1526_s13 }
 0x320   : > { %s1633_s27 = smov %s1516_s9  ;;  %21 = sbr.rel (!%p19_p9) target bundleno = 5 (0x5), region = 100 }
 0x327   :  { %876 = vsyncpa [#allocation3], 1 }
 0x328   :  { %878 = vsyncpa [#allocation3 + $0x1], 1 }
 0x329   :  { %879 = vsyncpa [#allocation5], 1 }
 0x32a   :  { %880 = vsyncpa [#allocation8], 1 }

</bundles_post_ra>
